<compile_context>
chip_gen: v7x
topology: tpu7x:2x2x1
jax: 0.10.0
libtpu: 0.0.40
codegen_flags: <defaults>
</compile_context>

<pallas_src>
import jax
import jax.numpy as jnp
from jax.experimental import pallas as pl
from jax.experimental.pallas import tpu as pltpu

IN_FEATURES = 784
HIDDEN = 128
OUT_FEATURES = 10

N_PAD = 128        # lane-dense fc2 MXU width; only the first 10 columns are stored
TILE_B_MAX = 2048  # largest batch tile (fits comfortably in a 32 MiB scoped-VMEM budget)
MIN_TILE_B = 8     # f32 sublane granularity


def _round_up(x, m):
    return ((x + m - 1) // m) * m


def _choose_tile_b(batch):
    """Batch tile: <= TILE_B_MAX, multiple of 8, divides the batch nearly evenly,
    and gives >= 2 balanced grid steps when there is enough work so both v7x
    TensorCores get a share (no effect / no harm on single-TC v5e/v6e)."""
    num_tiles = max(1, -(-batch // TILE_B_MAX))
    if num_tiles == 1 and batch > 2 * MIN_TILE_B:
        num_tiles = 2
    return _round_up(-(-batch // num_tiles), MIN_TILE_B)


def mlp_kernel(x_ref, w1_ref, b1_ref, w2_ref, b2_ref, o_ref):
    # fc1: cast the streamed f32 x tile to bf16 in-kernel (VPU), MXU matmul with
    # f32 accumulation, bias + ReLU in f32.
    x = x_ref[...].astype(jnp.bfloat16)
    h = jnp.dot(x, w1_ref[...], preferred_element_type=jnp.float32)
    h = jnp.maximum(h + b1_ref[...], 0.0)
    # fc2: lane-dense (K = N = 128) MXU matmul; store only the 10 real logits.
    o = jnp.dot(h.astype(jnp.bfloat16), w2_ref[...],
                preferred_element_type=jnp.float32)
    o_ref[...] = o[:, :OUT_FEATURES] + b2_ref[...]


@jax.jit
def simple_nn_forward(x, w1, b1, w2, b2):
    """x: (B, 784) f32 -> (B, 10) f32.

    Weights: w1 (784, 128), b1 (128,), w2 (128, 10), b2 (10,).
    x streams from HBM untouched (no pad/cast copy); only the tiny weights are
    cast/padded once in the wrapper.
    """
    B = x.shape[0]
    tile_b = _choose_tile_b(B)
    grid = (pl.cdiv(B, tile_b),)

    w1b = w1.astype(jnp.bfloat16)                                   # (784, 128)
    b1r = jnp.reshape(b1.astype(jnp.float32), (1, HIDDEN))          # (1, 128)
    w2b = jnp.zeros((HIDDEN, N_PAD), jnp.bfloat16)
    w2b = w2b.at[:, :OUT_FEATURES].set(w2.astype(jnp.bfloat16))     # (128, 128)
    b2r = jnp.reshape(b2.astype(jnp.float32), (1, OUT_FEATURES))    # (1, 10)

    flops = 2 * B * (IN_FEATURES * HIDDEN + HIDDEN * N_PAD)
    bytes_accessed = (B * IN_FEATURES * 4          # x read (f32, unpadded)
                      + w1b.size * 2 + w2b.size * 2
                      + b1r.size * 4 + b2r.size * 4
                      + B * OUT_FEATURES * 4)      # output write (f32, 10 wide)

    return pl.pallas_call(
        mlp_kernel,
        out_shape=jax.ShapeDtypeStruct((B, OUT_FEATURES), jnp.float32),
        grid=grid,
        in_specs=[
            pl.BlockSpec((tile_b, IN_FEATURES), lambda i: (i, 0)),  # x: streamed per tile
            pl.BlockSpec((IN_FEATURES, HIDDEN), lambda i: (0, 0)),  # w1: VMEM-resident
            pl.BlockSpec((1, HIDDEN), lambda i: (0, 0)),            # b1: VMEM-resident
            pl.BlockSpec((HIDDEN, N_PAD), lambda i: (0, 0)),        # w2: VMEM-resident
            pl.BlockSpec((1, OUT_FEATURES), lambda i: (0, 0)),      # b2: VMEM-resident
        ],
        out_specs=pl.BlockSpec((tile_b, OUT_FEATURES), lambda i: (i, 0)),
        compiler_params=pltpu.CompilerParams(
            dimension_semantics=("parallel",),   # megacore-shard the batch axis (v7x)
            vmem_limit_bytes=32 << 20,           # safe on v5e/v6e (128 MiB) and v7x (64 MiB)
        ),
        cost_estimate=pl.CostEstimate(
            flops=flops, transcendentals=0, bytes_accessed=bytes_accessed),
    )(x, w1b, b1r, w2b, b2r)


def init_params(key):
    """Deterministic init mimicking nn.Linear's uniform(-1/sqrt(fan_in), 1/sqrt(fan_in))."""
    k1, k2, k3, k4 = jax.random.split(key, 4)
    bound1 = 1.0 / jnp.sqrt(IN_FEATURES)
    bound2 = 1.0 / jnp.sqrt(HIDDEN)
    w1 = jax.random.uniform(k1, (IN_FEATURES, HIDDEN), jnp.float32, -bound1, bound1)
    b1 = jax.random.uniform(k2, (HIDDEN,), jnp.float32, -bound1, bound1)
    w2 = jax.random.uniform(k3, (HIDDEN, OUT_FEATURES), jnp.float32, -bound2, bound2)
    b2 = jax.random.uniform(k4, (OUT_FEATURES,), jnp.float32, -bound2, bound2)
    return w1, b1, w2, b2


if __name__ == "__main__":
    key = jax.random.PRNGKey(0)
    k_x, k_p = jax.random.split(key)
    B = 8
    x = jax.random.normal(k_x, (B, IN_FEATURES), jnp.float32)
    w1, b1, w2, b2 = init_params(k_p)

    out = jax.block_until_ready(simple_nn_forward(x, w1, b1, w2, b2))
    assert out.shape == (B, OUT_FEATURES)

    # Reference 1: bf16-input / f32-accumulate math (matches the kernel closely).
    xb = x.astype(jnp.bfloat16)
    h_ref = jnp.maximum(
        jnp.dot(xb, w1.astype(jnp.bfloat16), preferred_element_type=jnp.float32) + b1, 0.0)
    ref_bf16 = jnp.dot(h_ref.astype(jnp.bfloat16), w2.astype(jnp.bfloat16),
                       preferred_element_type=jnp.float32) + b2
    assert jnp.allclose(out, ref_bf16, atol=1e-3, rtol=1e-3)

    # Reference 2: full-f32 PyTorch-equivalent math (looser tolerance due to bf16 MXU inputs).
    ref_f32 = jnp.maximum(x @ w1 + b1, 0.0) @ w2 + b2
    assert jnp.allclose(out, ref_f32, atol=5e-2, rtol=5e-2)

    print("KERNEL_OK")
</pallas_src>

<mosaic_0001>
module attributes {stable_mosaic.version = 11 : i64} {
  func.func @mlp_kernel(%arg0: i32, %arg1: memref<8x784xf32, #tpu.memory_space<vmem>>, %arg2: memref<784x128xbf16, #tpu.memory_space<vmem>>, %arg3: memref<1x128xf32, #tpu.memory_space<vmem>>, %arg4: memref<128x128xbf16, #tpu.memory_space<vmem>>, %arg5: memref<1x10xf32, #tpu.memory_space<vmem>>, %arg6: memref<8x10xf32, #tpu.memory_space<vmem>>) attributes {dimension_semantics = [#tpu.dimension_semantics<parallel>], iteration_bounds = array<i64: 1>, scalar_prefetch = 0 : i64, scratch_operands = 0 : i64, tpu.core_type = #tpu.core_type<tc>, window_params = [{transform_indices = @transform_0, window_bounds = array<i64: 8, 784>}, {pipeline_mode = #tpu.pipeline_mode<synchronous>, transform_indices = @transform_1, window_bounds = array<i64: 784, 128>}, {pipeline_mode = #tpu.pipeline_mode<synchronous>, transform_indices = @transform_2, window_bounds = array<i64: 1, 128>}, {pipeline_mode = #tpu.pipeline_mode<synchronous>, transform_indices = @transform_3, window_bounds = array<i64: 128, 128>}, {pipeline_mode = #tpu.pipeline_mode<synchronous>, transform_indices = @transform_4, window_bounds = array<i64: 1, 10>}, {transform_indices = @transform_5, window_bounds = array<i64: 8, 10>}]} {
    %c0 = arith.constant 0 : index
    %c0_0 = arith.constant 0 : index
    %0 = vector.load %arg1[%c0, %c0_0] : memref<8x784xf32, #tpu.memory_space<vmem>>, vector<8x784xf32>
    %1 = arith.truncf %0 : vector<8x784xf32> to vector<8x784xbf16>
    %c0_1 = arith.constant 0 : index
    %c0_2 = arith.constant 0 : index
    %2 = vector.load %arg2[%c0_1, %c0_2] : memref<784x128xbf16, #tpu.memory_space<vmem>>, vector<784x128xbf16>
    %cst = arith.constant dense<0.000000e+00> : vector<8x128xf32>
    %3 = tpu.matmul %1, %2, %cst {dimension_numbers = #tpu.dot_dimension_numbers<[1], [0], [0], [1], [0, 0, 1, 1], [], []>} : vector<8x784xbf16>, vector<784x128xbf16>, vector<8x128xf32> -> vector<8x128xf32>
    %c0_3 = arith.constant 0 : index
    %c0_4 = arith.constant 0 : index
    %4 = vector.load %arg3[%c0_3, %c0_4] : memref<1x128xf32, #tpu.memory_space<vmem>>, vector<1x128xf32>
    %5 = vector.broadcast %4 : vector<1x128xf32> to vector<8x128xf32>
    %6 = arith.addf %3, %5 : vector<8x128xf32>
    %cst_5 = arith.constant 0.000000e+00 : f32
    %7 = vector.broadcast %cst_5 : f32 to vector<8x128xf32>
    %8 = arith.maximumf %6, %7 : vector<8x128xf32>
    %9 = arith.truncf %8 : vector<8x128xf32> to vector<8x128xbf16>
    %c0_6 = arith.constant 0 : index
    %c0_7 = arith.constant 0 : index
    %10 = vector.load %arg4[%c0_6, %c0_7] : memref<128x128xbf16, #tpu.memory_space<vmem>>, vector<128x128xbf16>
    %cst_8 = arith.constant dense<0.000000e+00> : vector<8x128xf32>
    %11 = tpu.matmul %9, %10, %cst_8 {dimension_numbers = #tpu.dot_dimension_numbers<[1], [0], [0], [1], [0, 0, 1, 1], [], []>} : vector<8x128xbf16>, vector<128x128xbf16>, vector<8x128xf32> -> vector<8x128xf32>
    %12 = vector.extract_strided_slice %11 {offsets = [0, 0], sizes = [8, 10], strides = [1, 1]} : vector<8x128xf32> to vector<8x10xf32>
    %c0_9 = arith.constant 0 : index
    %c0_10 = arith.constant 0 : index
    %13 = vector.load %arg5[%c0_9, %c0_10] : memref<1x10xf32, #tpu.memory_space<vmem>>, vector<1x10xf32>
    %14 = vector.broadcast %13 : vector<1x10xf32> to vector<8x10xf32>
    %15 = arith.addf %12, %14 : vector<8x10xf32>
    %c0_11 = arith.constant 0 : index
    %c0_12 = arith.constant 0 : index
    %16 = vector.load %arg6[%c0_11, %c0_12] : memref<8x10xf32, #tpu.memory_space<vmem>>, vector<8x10xf32>
    tpu.vector_store %arg6[%c0_11, %c0_12], %15 {strides = array<i32>} : memref<8x10xf32, #tpu.memory_space<vmem>>, vector<8x10xf32>,
    return
  }
  func.func @transform_0(%arg0: i32) -> (i32, i32) {
    %c0_i32 = arith.constant 0 : i32
    %c0_i32_0 = arith.constant 0 : i32
    return %arg0, %c0_i32 : i32, i32
  }
  func.func @transform_1(%arg0: i32) -> (i32, i32) {
    %c0_i32 = arith.constant 0 : i32
    %c0_i32_0 = arith.constant 0 : i32
    %c0_i32_1 = arith.constant 0 : i32
    return %c0_i32, %c0_i32_0 : i32, i32
  }
  func.func @transform_2(%arg0: i32) -> (i32, i32) {
    %c0_i32 = arith.constant 0 : i32
    %c0_i32_0 = arith.constant 0 : i32
    %c0_i32_1 = arith.constant 0 : i32
    return %c0_i32, %c0_i32_0 : i32, i32
  }
  func.func @transform_3(%arg0: i32) -> (i32, i32) {
    %c0_i32 = arith.constant 0 : i32
    %c0_i32_0 = arith.constant 0 : i32
    %c0_i32_1 = arith.constant 0 : i32
    return %c0_i32, %c0_i32_0 : i32, i32
  }
  func.func @transform_4(%arg0: i32) -> (i32, i32) {
    %c0_i32 = arith.constant 0 : i32
    %c0_i32_0 = arith.constant 0 : i32
    %c0_i32_1 = arith.constant 0 : i32
    return %c0_i32, %c0_i32_0 : i32, i32
  }
  func.func @transform_5(%arg0: i32) -> (i32, i32) {
    %c0_i32 = arith.constant 0 : i32
    %c0_i32_0 = arith.constant 0 : i32
    return %arg0, %c0_i32 : i32, i32
  }
}

</mosaic_0001>

<bundles_post_ra>
// kernel: simple_nn_forward.1
= control target key start
LH: loop header
LB: loop body
LE: loop exit
PB: predicated region body
PF: predicated region fallthrough
CT: control target
= control target key end

     0   :  { %v976_v44 = vmov 0.0   ;;  %vm977_vm0 = vmmov 0   ;;  %vm435_vm1 = vcmask 130048   ;;  %s1232_s0 = inlined_call_operand.vmem [shape: f32[8,784], index: 0, kind: input, shape index: {}]   ;;  %s1233_s1 = inlined_call_operand.vmem [shape: bf16[784,128], index: 1, kind: input, shape index: {}]   ;;  %s1234_s2 = inlined_call_operand.vmem [shape: f32[1,128], index: 2, kind: input, shape index: {}]   ;;  %s1235_s3 = inlined_call_operand.vmem [shape: bf16[128,128], index: 3, kind: input, shape index: {}]   ;;  %s1236_s4 = inlined_call_operand.vmem [shape: f32[1,10], index: 4, kind: input, shape index: {}]   ;;  %s1237_s5 = inlined_call_operand.hbm [shape: f32[8,10], index: 5, kind: output, shape index: {}]  }
   0x1   :  { %v895_v0 = vld [vmem:[%s1233_s1 + $0x40] sm:$0xff]   ;;  %v899_v4 = vld [vmem:[%s1233_s1 + $0x48] sm:$0xff]   ;;  %v903_v8 = vld [vmem:[%s1233_s1 + $0x50] sm:$0xff]  }
   0x2   :  { %v896_v1 = vld [vmem:[%s1233_s1] sm:$0xff]   ;;  %789 = vmatprep.subr.bf16.mxu0 %v895_v0  ;;  %v900_v5 = vld [vmem:[%s1233_s1 + $0x8] sm:$0xff]   ;;  %v904_v9 = vld [vmem:[%s1233_s1 + $0x10] sm:$0xff]  }
   0x3   :  { %v897_v2 = vld [vmem:[%s1233_s1 + $0xc0] sm:$0xff]   ;;  %790 = vmatpush3.bf16.msra.mxu0 %v896_v1  ;;  %v901_v6 = vld [vmem:[%s1233_s1 + $0xc8] sm:$0xff]   ;;  %v905_v10 = vld [vmem:[%s1233_s1 + $0xd0] sm:$0xff]  }
   0x4   :  { %v898_v3 = vld [vmem:[%s1233_s1 + $0x80] sm:$0xff]   ;;  %811 = vmatprep.subr.bf16.mxu1 %v897_v2  ;;  %791 = vmatprep.subr.bf16.mxu0 %v899_v4  ;;  %v902_v7 = vld [vmem:[%s1233_s1 + $0x88] sm:$0xff]   ;;  %v906_v11 = vld [vmem:[%s1233_s1 + $0x90] sm:$0xff]  }
   0x5   :  { %812 = vmatpush3.bf16.msra.mxu1 %v898_v3  ;;  %v907_v12 = vld [vmem:[%s1233_s1 + $0x58] sm:$0xff]   ;;  %v911_v16 = vld [vmem:[%s1233_s1 + $0x60] sm:$0xff]   ;;  %v915_v20 = vld [vmem:[%s1233_s1 + $0x68] sm:$0xff]  }
   0x6   :  { %813 = vmatprep.subr.bf16.mxu1 %v901_v6  ;;  %v908_v13 = vld [vmem:[%s1233_s1 + $0x18] sm:$0xff]   ;;  %v912_v17 = vld [vmem:[%s1233_s1 + $0x20] sm:$0xff]   ;;  %v916_v21 = vld [vmem:[%s1233_s1 + $0x28] sm:$0xff]  }
   0x7   :  { %792 = vmatpush3.bf16.msra.mxu0 %v900_v5  ;;  %v909_v14 = vld [vmem:[%s1233_s1 + $0xd8] sm:$0xff]   ;;  %v913_v18 = vld [vmem:[%s1233_s1 + $0xe0] sm:$0xff]   ;;  %v917_v22 = vld [vmem:[%s1233_s1 + $0xe8] sm:$0xff]  }
   0x8   :  { %793 = vmatprep.subr.bf16.mxu0 %v903_v8  ;;  %v910_v15 = vld [vmem:[%s1233_s1 + $0x98] sm:$0xff]   ;;  %v914_v19 = vld [vmem:[%s1233_s1 + $0xa0] sm:$0xff]   ;;  %v918_v23 = vld [vmem:[%s1233_s1 + $0xa8] sm:$0xff]  }
   0x9   :  { %814 = vmatpush3.bf16.msra.mxu1 %v902_v7  ;;  %v919_v24 = vld [vmem:[%s1233_s1 + $0x70] sm:$0xff]   ;;  %v923_v28 = vld [vmem:[%s1233_s1 + $0x78] sm:$0xff]   ;;  %v23_v31 = vld [vmem:[%s1232_s0 + $0x8] sm:$0xff] }
   0xa   :  { %815 = vmatprep.subr.bf16.mxu1 %v905_v10  ;;  %v920_v25 = vld [vmem:[%s1233_s1 + $0x30] sm:$0xff]   ;;  %v924_v29 = vld [vmem:[%s1233_s1 + $0x38] sm:$0xff]   ;;  %v30_v32 = vpack.c.bf16 %v23_v31, %v23_v31  ;;  %v22_v34 = vld [vmem:[%s1232_s0] sm:$0xff] }
   0xb   :  { %794 = vmatpush3.bf16.msra.mxu0 %v904_v9  ;;  %v921_v26 = vld [vmem:[%s1233_s1 + $0xf0] sm:$0xff]   ;;  %v925_v30 = vld [vmem:[%s1233_s1 + $0xf8] sm:$0xff]   ;;  %v29_v35 = vpack.c.bf16 %v22_v34, %v22_v34  ;;  %v927_v36 = vld [vmem:[%s1233_s1 + $0x140] sm:$0xff]  }
   0xc   :  { %795 = vmatprep.subr.bf16.mxu0 %v907_v12  ;;  %v922_v27 = vld [vmem:[%s1233_s1 + $0xb0] sm:$0xff]   ;;  %v926_v33 = vld [vmem:[%s1233_s1 + $0xb8] sm:$0xff]   ;;  %471 = vmatprep.mubr.bf16.mxu0 %v30_v32  ;;  %v928_v39 = vld [vmem:[%s1233_s1 + $0x100] sm:$0xff]  }
   0xd   :  { %816 = vmatpush3.bf16.msra.mxu1 %v906_v11  ;;  %v25_v37 = vld [vmem:[%s1232_s0 + $0x18] sm:$0xff]  ;;  %v24_v40 = vld [vmem:[%s1232_s0 + $0x10] sm:$0xff]  ;;  %v929_v42 = vld [vmem:[%s1233_s1 + $0x148] sm:$0xff]  }
   0xe   :  { %817 = vmatprep.subr.bf16.mxu1 %v909_v14  ;;  %v32_v38 = vpack.c.bf16 %v25_v37, %v25_v37  ;;  %v31_v41 = vpack.c.bf16 %v24_v40, %v24_v40  ;;  %v930_v43 = vld [vmem:[%s1233_s1 + $0x108] sm:$0xff]   ;;  %v931_v45 = vld [vmem:[%s1233_s1 + $0x150] sm:$0xff]   ;;  %v933_v47 = vld [vmem:[%s1233_s1 + $0x158] sm:$0xff]  }
   0xf   :  { %796 = vmatpush3.bf16.msra.mxu0 %v908_v13  ;;  %v932_v46 = vld [vmem:[%s1233_s1 + $0x110] sm:$0xff]   ;;  %v934_v48 = vld [vmem:[%s1233_s1 + $0x118] sm:$0xff]   ;;  %v935_v49 = vld [vmem:[%s1233_s1 + $0x160] sm:$0xff]  }
  0x10   :  { %797 = vmatprep.subr.bf16.mxu0 %v911_v16  ;;  %511 = vmatprep.mubr.bf16.mxu1 %v32_v38  ;;  %v936_v50 = vld [vmem:[%s1233_s1 + $0x120] sm:$0xff]   ;;  %v937_v51 = vld [vmem:[%s1233_s1 + $0x168] sm:$0xff]   ;;  %v939_v55 = vld [vmem:[%s1233_s1 + $0x170] sm:$0xff]  }
  0x11   :  { %818 = vmatpush3.bf16.msra.mxu1 %v910_v15  ;;  %v938_v52 = vld [vmem:[%s1233_s1 + $0x128] sm:$0xff]   ;;  %v943_v53 = vld [vmem:[%s1233_s1 + $0x180] sm:$0xff]   ;;  %v28_v57 = vld [vmem:[%s1232_s0 + $0x30] sm:$0xff] }
  0x12   :  { %819 = vmatprep.subr.bf16.mxu1 %v913_v18  ;;  %v27_v54 = vld [vmem:[%s1232_s0 + $0x28] sm:$0xff]  ;;  %v35_v58 = vpack.c.bf16 %v28_v57, %v28_v57  ;;  %v940_v59 = vld [vmem:[%s1233_s1 + $0x130] sm:$0xff]  }
  0x13   :  { %798 = vmatpush3.bf16.msra.mxu0 %v912_v17  ;;  %v34_v56 = vpack.c.bf16 %v27_v54, %v27_v54 }
  0x14   :  { %799 = vmatprep.subr.bf16.mxu0 %v915_v20 }
  0x15   :  { %820 = vmatpush3.bf16.msra.mxu1 %v914_v19 }
  0x16   :  { %821 = vmatprep.subr.bf16.mxu1 %v917_v22 }
  0x17   :  { %800 = vmatpush3.bf16.msra.mxu0 %v916_v21 }
  0x18   :  { %801 = vmatprep.subr.bf16.mxu0 %v919_v24 }
  0x19   :  { %822 = vmatpush3.bf16.msra.mxu1 %v918_v23 }
  0x1a   :  { %823 = vmatprep.subr.bf16.mxu1 %v921_v26 }
  0x1b   :  { %802 = vmatpush3.bf16.msra.mxu0 %v920_v25 }
  0x1c   :  { %803 = vmatprep.subr.bf16.mxu0 %v923_v28 }
  0x1d   :  { %824 = vmatpush3.bf16.msra.mxu1 %v922_v27 }
  0x1e   :  { %825 = vmatprep.subr.bf16.mxu1 %v925_v30 }
  0x1f   :  { %804 = vmatpush3.bf16.msra.mxu0 %v924_v29 }
  0x20   :  { %833 = vmatprep.subr.bf16.mxu0 %v927_v36 }
  0x21   :  { %826 = vmatpush3.bf16.msra.mxu1 %v926_v33 }
  0x22   :  { %472 = vmatmul.mubr.bf16.vlgmr.msra.gmra.mrb[0].mxu0 %v29_v35  ;;  %866 = vmatprep.subr.bf16.mxu1 %v976_v44 }
  0x23   :  { %834 = vmatpush3.bf16.msra.mxu0 %v928_v39  ;;  %551 = vmatprep.mubr.bf16.mxu0 %v34_v56 }
  0x24   :  { %512 = vmatmul.mubr.bf16.vlgmr.msra.gmra.mrb[0].mxu1 %v31_v41  ;;  %835 = vmatprep.subr.bf16.mxu0 %v929_v42 }
  0x25   :  { %868 = vmatprep.mubr.msk.bf16.mxu1 %vm977_vm0, %v976_v44  ;;  %867 = vmatpush3.bf16.msra.mxu1 %v943_v53 }
  0x26   :  { %872 = vmatprep.subr.bf16.mxu1 %v976_v44 }
  0x27   :  { %836 = vmatpush3.bf16.msra.mxu0 %v930_v43 }
  0x28   :  { %837 = vmatprep.subr.bf16.mxu0 %v931_v45 }
  0x2b   :  { %838 = vmatpush3.bf16.msra.mxu0 %v932_v46 }
  0x2c   :  { %839 = vmatprep.subr.bf16.mxu0 %v933_v47  ;;  %869 = vmatmul.mubr.msk.bf16.vlgmr.msra.gmra.mrb[4].mxu1 %vm435_vm1, %v35_v58 }
  0x2d   :  { %888 = vmatprep.mubr.msk.bf16.mxu1 %vm977_vm0, %v976_v44 }
  0x2f   :  { %840 = vmatpush3.bf16.msra.mxu0 %v934_v48 }
  0x30   :  { %841 = vmatprep.subr.bf16.mxu0 %v935_v49 }
  0x33   :  { %842 = vmatpush3.bf16.msra.mxu0 %v936_v50 }
  0x34   :  { %843 = vmatprep.subr.bf16.mxu0 %v937_v51 }
  0x37   :  { %844 = vmatpush3.bf16.msra.mxu0 %v938_v52 }
  0x38   :  { %10 = vsyncpa [#allocation3], 0  ;;  %845 = vmatprep.subr.bf16.mxu0 %v939_v55  ;;  %v941_v60 = vld [vmem:[%s1233_s1 + $0x178] sm:$0xff]   ;;  %v26_v62 = vld [vmem:[%s1232_s0 + $0x20] sm:$0xff]  ;;  %s978_s21 = smov [#allocation2]   ;;  %vm713_vm2 = vcmask 80896  }
  0x39   :  { %v942_v61 = vld [vmem:[%s1233_s1 + $0x138] sm:$0xff]   ;;  %v33_v63 = vpack.c.bf16 %v26_v62, %v26_v62  ;;  %v944_v0 = vld [vmem:[%s1235_s3] sm:$0xff]   ;;  %v945_v1 = vld [vmem:[%s1235_s3 + $0x8] sm:$0xff]   ;;  %s721_s22 = sshll.u32 %s978_s21, 4  ;;  %s722_s22 = int_to_ptr.vmem [resolvable:$true] %s721_s22 }
  0x3a   :  { %873 = vmatpush3.bf16.msra.mxu1 %v944_v0  ;;  %v946_v2 = vld [vmem:[%s1235_s3 + $0x10] sm:$0xff]   ;;  %v947_v3 = vld [vmem:[%s1235_s3 + $0x18] sm:$0xff]   ;;  %v948_v4 = vld [vmem:[%s1235_s3 + $0x20] sm:$0xff]   ;;  %s952_s23 = scalar_lea.vmem %s722_s22, 128  ;;  %p957_p1 = scmp.lt.s32.totalorder %s722_s22, %s722_s22 }
  0x3b   :  { %846 = vmatpush3.bf16.msra.mxu0 %v940_v59  ;;  %874 = vmatprep.subr.bf16.mxu1 %v976_v44  ;;  %v949_v5 = vld [vmem:[%s1235_s3 + $0x28] sm:$0xff]   ;;  %v950_v6 = vld [vmem:[%s1235_s3 + $0x30] sm:$0xff]   ;;  %v951_v7 = vld [vmem:[%s1235_s3 + $0x38] sm:$0xff]   ;;  %p953_p0 = scmp.ne.s32.totalorder %s722_s22, %s952_s23  ;;  %p958_p2 = scmp.lt.s32.totalorder %s952_s23, %s952_s23 }
  0x3c   :  { %847 = vmatprep.subr.bf16.mxu0 %v941_v60  ;;  %v729_v9 = vld [vmem:[%s1234_s2] ss:$0 sm:$0xff] }
  0x3d   :  { %v788_v34 = vld [vmem:[%s1236_s4] ss:$0 sm:$0xff]  ;;  %p959_p3 = por %p958_p2, %p957_p1 }
  0x3e   :  { %875 = vmatpush3.bf16.msra.mxu1 %v945_v1 }
  0x3f   :  { %848 = vmatpush3.bf16.msra.mxu0 %v942_v61  ;;  %876 = vmatprep.subr.bf16.mxu1 %v976_v44  ;;  %p960_p4 = pnand %p959_p3, %p953_p0 }
  0x42   :  { %552 = vmatmul.mubr.bf16.vlgmr.msra.gmra.mrb[4].mxu0 %v33_v63  ;;  %877 = vmatpush3.bf16.msra.mxu1 %v946_v2 }
  0x43   :  { %878 = vmatprep.subr.bf16.mxu1 %v976_v44 }
  0x46   :  { %879 = vmatpush3.bf16.msra.mxu1 %v947_v3 }
  0x47   :  { %880 = vmatprep.subr.bf16.mxu1 %v976_v44 }
  0x4a   :  { %881 = vmatpush3.bf16.msra.mxu1 %v948_v4 }
  0x4b   :  { %882 = vmatprep.subr.bf16.mxu1 %v976_v44 }
  0x4e   :  { %883 = vmatpush3.bf16.msra.mxu1 %v949_v5 }
  0x4f   :  { %884 = vmatprep.subr.bf16.mxu1 %v976_v44 }
  0x52   :  { %885 = vmatpush3.bf16.msra.mxu1 %v950_v6 }
  0x53   :  { %886 = vmatprep.subr.bf16.mxu1 %v976_v44 }
  0x56   :  { %887 = vmatpush3.bf16.msra.mxu1 %v951_v7 }
  0xf5   :  { %v805_v8 = vpop.f32.mrb[0].mxu0 }
  0xf6   :  { %v806_v10 = vpop.f32.mrb[1].mxu0 }
  0xf7   :  { %v807_v11 = vadd.f32 %v806_v10, %v805_v8  ;;  %v808_v12 = vpop.f32.mrb[2].mxu0  ;;  %v827_v13 = vpop.f32.mrb[0].mxu1 }
  0xf8   :  { %v809_v14 = vpop.f32.mrb[3].mxu0  ;;  %v828_v16 = vpop.f32.mrb[1].mxu1 }
  0xf9   :  { %v474_v15 = vadd.f32 %v807_v11, %v729_v9  ;;  %v829_v17 = vadd.f32 %v828_v16, %v827_v13  ;;  %v830_v18 = vpop.f32.mrb[2].mxu1 }
  0xfa   :  { %v831_v19 = vpop.f32.mrb[3].mxu1 }
  0xfb   :  { %v514_v20 = vadd.f32 %v829_v17, %v474_v15 }
  0xff   :  { %v593_v21 = vpop.f32.mrb[4].mxu1 }
 0x100   :  { %v870_v22 = vpop.f32.mrb[5].mxu1 }
 0x101   :  { %v596_v23 = vpop.f32.mrb[6].mxu1 }
 0x102   :  { %v871_v24 = vpop.f32.mrb[7].mxu1 }
 0x115   :  { %v849_v25 = vpop.f32.mrb[4].mxu0 }
 0x116   :  { %v850_v26 = vpop.f32.mrb[5].mxu0 }
 0x117   :  { %v851_v27 = vadd.f32 %v850_v26, %v849_v25  ;;  %v852_v28 = vpop.f32.mrb[6].mxu0 }
 0x118   :  { %v853_v29 = vpop.f32.mrb[7].mxu0 }
 0x119   :  { %v554_v30 = vadd.f32 %v851_v27, %v514_v20 }
 0x11b   :  { %v594_v31 = vadd.f32 %v593_v21, %v554_v30 }
 0x11d   :  { %v599_v32 = vmax.f32 %v594_v31, 0.0 }
 0x11f   :  { %v600_v33 = vpack.c.bf16 %v599_v32, %v599_v32 }
 0x121   :  { %889 = vmatmul.mubr.bf16.vlgmr.msra.gmra.mrb[8].mxu1 %v600_v33 }
 0x1f4   :  { %v699_v35 = vpop.f32.mrb[8].mxu1 }
 0x1f5   :  { %v712_v36 = vadd.f32 %v788_v34, %v699_v35  ;;  %v890_v37 = vpop.f32.mrb[9].mxu1 }
 0x1f6   :  { %v702_v38 = vpop.f32.mrb[10].mxu1 }
 0x1f7   :  { %v891_v39 = vpop.f32.mrb[11].mxu1  ;;  %714 = vst.msk [vmem:[#allocation2] sm:$0xff] %vm713_vm2, %v712_v36 }
 0x1f8   :  { %963 = shalt.err (!%p960_p4)
}
 0x1f9   :  { %s964_s4 = scalar_lea.hbm %s1237_s5, 128 }
 0x1fa   :  { %p965_p5 = scmp.ne.s32.totalorder %s1237_s5, %s964_s4  ;;  %p968_p6 = scmp.lt.u32.totalorder %s964_s4, %s1237_s5 }
 0x1fc   :  { %p970_p7 = pnand %p968_p6, %p965_p5 }
 0x1fe   :  { %973 = shalt.err (!%p970_p7)
}
 0x1ff   :  { %724 = dma.vmem_to_hbm [thread:$0]  %s722_s22, 128, %s1237_s5, [#allocation3]  }
 0x200   :  { %974 = dma.done.wait [#allocation3], 128  }
 0x201   :  { %975 = vsyncadd [#allocation3], 4294967168 }
 0x202   :  { %728 = vsyncpa [#allocation3], 1 }

</bundles_post_ra>
